<compile_context>
chip_gen: v7x
topology: tpu7x:2x2x1
jax: 0.10.0
libtpu: 0.0.40
codegen_flags: <defaults>
</compile_context>

<pallas_src>
import jax
import jax.numpy as jnp
from jax.experimental import pallas as pl
from jax.experimental.pallas import tpu as pltpu

NUM_CLASSES = 10
BN_EPS = 1e-5
IN_DIM = 256
H1 = 128
H2 = 64
# Rows per batch tile.  2048 is large enough to amortize the ~0.35 us per-grid
# step overhead on v6e/v7x while the double-buffered tiles + compiler scratch
# (~10-12 MiB) stay inside the 32 MiB vmem limit we request (fits v5e/v6e/v7x).
TM_MAX = 2048


def _round_up(n: int, m: int) -> int:
    return ((n + m - 1) // m) * m


def _pick_tile(batch: int, tm_max: int):
    """Choose (rows_per_tile, padded_batch).

    Policy (cheap, trace-time Python):
      * tiny batch (<=16 rows): single tile, block == full array.
      * batch fits in two tiles: exactly 2 grid steps (keeps both v7x
        TensorCores busy via the "parallel" axis).
      * large batch: prefer a 16-row-aligned tile that divides the batch
        exactly (skips the jnp.pad copy), else pad up to tm_max tiles.
    """
    b8 = _round_up(batch, 8)
    if b8 <= 16:
        return b8, b8

    b16 = _round_up(batch, 16)            # 16-row granularity (bf16 sublane pack)
    tm_cap = max(16, tm_max - (tm_max % 16))

    if b16 <= 2 * tm_cap:
        half = _round_up(b16 // 2, 16)
        return half, 2 * half

    # Large batch: look for a divisor of b16 (== batch when batch % 16 == 0).
    tm = tm_cap
    while tm >= max(256, tm_cap // 4):
        if batch == b16 and b16 % tm == 0:
            return tm, b16
        tm -= 16
    return tm_cap, _round_up(b16, tm_cap)


def _pointnet_cls_kernel(x_ref, w1_ref, b1_ref, w2_ref, b2_ref, w3_ref, b3_ref, o_ref):
    # Cast to bf16 in-register (no standalone HBM cast pass in the wrapper).
    x = x_ref[...].astype(jnp.bfloat16)

    # ---- fc_1 (+ folded bn_1) + relu ------------------------------------
    h1 = jnp.dot(x, w1_ref[...], preferred_element_type=jnp.float32)
    h1 = jnp.maximum(h1 + b1_ref[...], 0.0).astype(jnp.bfloat16)

    # ---- fc_2 (+ folded bn_2) + relu ------------------------------------
    h2 = jnp.dot(h1, w2_ref[...], preferred_element_type=jnp.float32)
    h2 = jnp.maximum(h2 + b2_ref[...], 0.0).astype(jnp.bfloat16)

    # ---- dropout: eval-mode identity -------------------------------------

    # ---- fc_3 + log_softmax over padded (lane-dense) class dim -----------
    logits = jnp.dot(h2, w3_ref[...], preferred_element_type=jnp.float32) + b3_ref[...]
    mx = jnp.max(logits, axis=-1, keepdims=True)
    shifted = logits - mx
    lse = jnp.log(jnp.sum(jnp.exp(shifted), axis=-1, keepdims=True))
    o_ref[...] = (shifted - lse).astype(o_ref.dtype)


def _fold_and_pack_params(params):
    """Fold eval-mode BatchNorm into the Linear weights, pad fc_3 to a
    lane-dense width, cast weights to bf16 (biases stay f32)."""
    s1 = params["g1"] * jax.lax.rsqrt(params["v1"] + BN_EPS)             # (1, 128)
    w1 = (params["w1"] * s1).astype(jnp.bfloat16)                         # (256, 128)
    b1 = (params["b1"] - params["m1"]) * s1 + params["beta1"]             # (1, 128) f32

    s2 = params["g2"] * jax.lax.rsqrt(params["v2"] + BN_EPS)              # (1, 64)
    w2 = (params["w2"] * s2).astype(jnp.bfloat16)                          # (128, 64)
    b2 = (params["b2"] - params["m2"]) * s2 + params["beta2"]             # (1, 64) f32

    C = params["w3"].shape[1]
    C_pad = max(128, _round_up(C, 128))
    w3 = jnp.zeros((H2, C_pad), jnp.float32).at[:, :C].set(params["w3"])
    w3 = w3.astype(jnp.bfloat16)                                           # (64, C_pad)
    # Large negative *finite* bias on padding lanes -> exp() underflows to 0,
    # no inf-inf NaNs in the max-shift; pad lanes end up at ~-1e30 log-prob.
    b3 = jnp.full((1, C_pad), -1e30, jnp.float32).at[:, :C].set(params["b3"])
    return w1, b1, w2, b2, w3, b3, C, C_pad


def classification_pointnet_forward(x, params, tm=TM_MAX, trim=False):
    """x: any shape with total elements divisible by 256 (matches x.view(-1, 256)).

    Returns the padded (Bp, 128) bf16 log-prob slab by default (consumers must
    read rows < B and lanes < num_classes).  Pass trim=True for the exact
    (B, num_classes) PyTorch-shaped output (costs one extra HBM pass).
    """
    x2d = x.reshape(-1, IN_DIM)            # no dtype cast here (cast is in-kernel)
    B = x2d.shape[0]

    w1, b1, w2, b2, w3, b3, C, C_pad = _fold_and_pack_params(params)

    TM, Bp = _pick_tile(B, tm)
    if Bp != B:
        x2d = jnp.pad(x2d, ((0, Bp - B), (0, 0)))

    grid = (Bp // TM,)
    out = pl.pallas_call(
        _pointnet_cls_kernel,
        out_shape=jax.ShapeDtypeStruct((Bp, C_pad), jnp.bfloat16),
        grid=grid,
        in_specs=[
            pl.BlockSpec((TM, IN_DIM), lambda i: (i, 0)),     # x: tiled over batch
            pl.BlockSpec((IN_DIM, H1), lambda i: (0, 0)),     # weights/biases:
            pl.BlockSpec((1, H1), lambda i: (0, 0)),          # constant index_map ->
            pl.BlockSpec((H1, H2), lambda i: (0, 0)),         # fetched once, stay
            pl.BlockSpec((1, H2), lambda i: (0, 0)),          # VMEM-resident.
            pl.BlockSpec((H2, C_pad), lambda i: (0, 0)),
            pl.BlockSpec((1, C_pad), lambda i: (0, 0)),
        ],
        out_specs=pl.BlockSpec((TM, C_pad), lambda i: (i, 0)),
        compiler_params=pltpu.CompilerParams(
            dimension_semantics=("parallel",),
            vmem_limit_bytes=32 * 1024 * 1024),
    )(x2d, w1, b1, w2, b2, w3, b3)

    if trim:
        return out[:B, :C]
    return out


def init_params(key, num_classes=NUM_CLASSES):
    """Deterministic synthetic parameters matching the module's shapes.

    Linear weights are stored pre-transposed: (in_features, out_features),
    so the kernel computes x @ W + b (== PyTorch x @ W_torch.T + b).
    """
    ks = jax.random.split(key, 6)

    def lin(kw, kb, fan_in, fan_out):
        bound = 1.0 / jnp.sqrt(fan_in)
        w = jax.random.uniform(kw, (fan_in, fan_out), jnp.float32, -bound, bound)
        b = jax.random.uniform(kb, (1, fan_out), jnp.float32, -bound, bound)
        return w, b

    w1, b1 = lin(ks[0], ks[1], IN_DIM, H1)
    w2, b2 = lin(ks[2], ks[3], H1, H2)
    w3, b3 = lin(ks[4], ks[5], H2, num_classes)

    # BatchNorm1d defaults: gamma=1, beta=0, running_mean=0, running_var=1
    # (inference / eval-mode semantics).
    params = dict(
        w1=w1, b1=b1,
        g1=jnp.ones((1, H1), jnp.float32), beta1=jnp.zeros((1, H1), jnp.float32),
        m1=jnp.zeros((1, H1), jnp.float32), v1=jnp.ones((1, H1), jnp.float32),
        w2=w2, b2=b2,
        g2=jnp.ones((1, H2), jnp.float32), beta2=jnp.zeros((1, H2), jnp.float32),
        m2=jnp.zeros((1, H2), jnp.float32), v2=jnp.ones((1, H2), jnp.float32),
        w3=w3, b3=b3,
    )
    return params


if __name__ == "__main__":
    key = jax.random.PRNGKey(0)
    k_param, k_x = jax.random.split(key)

    params = init_params(k_param, num_classes=NUM_CLASSES)

    # Example input: (2, 4, 16, 16) -> view(-1, 256) -> (8, 256)
    x = jax.random.normal(k_x, (2, 4, 16, 16), dtype=jnp.float32)

    out_padded = classification_pointnet_forward(x, params)   # (Bp, 128) bf16 slab
    out_padded = jax.block_until_ready(out_padded)

    B = 8
    # Consumer-style read: only rows < B and lanes < num_classes are meaningful.
    lp = out_padded[:B, :NUM_CLASSES].astype(jnp.float32)
    assert lp.shape == (B, NUM_CLASSES), lp.shape
    # log_softmax rows must sum (in prob space) to ~1  (bf16 output tolerance).
    row_sums = jnp.sum(jnp.exp(lp), axis=1)
    assert bool(jnp.all(jnp.abs(row_sums - 1.0) < 3e-2)), row_sums
    assert bool(jnp.all(jnp.isfinite(lp)))

    print("KERNEL_OK")
</pallas_src>

<mosaic_0001>
module attributes {stable_mosaic.version = 11 : i64} {
  func.func @_pointnet_cls_kernel(%arg0: i32, %arg1: memref<8x256xf32, #tpu.memory_space<vmem>>, %arg2: memref<256x128xbf16, #tpu.memory_space<vmem>>, %arg3: memref<1x128xf32, #tpu.memory_space<vmem>>, %arg4: memref<128x64xbf16, #tpu.memory_space<vmem>>, %arg5: memref<1x64xf32, #tpu.memory_space<vmem>>, %arg6: memref<64x128xbf16, #tpu.memory_space<vmem>>, %arg7: memref<1x128xf32, #tpu.memory_space<vmem>>, %arg8: memref<8x128xbf16, #tpu.memory_space<vmem>>) attributes {dimension_semantics = [#tpu.dimension_semantics<parallel>], iteration_bounds = array<i64: 1>, scalar_prefetch = 0 : i64, scratch_operands = 0 : i64, tpu.core_type = #tpu.core_type<tc>, window_params = [{transform_indices = @transform_0, window_bounds = array<i64: 8, 256>}, {pipeline_mode = #tpu.pipeline_mode<synchronous>, transform_indices = @transform_1, window_bounds = array<i64: 256, 128>}, {pipeline_mode = #tpu.pipeline_mode<synchronous>, transform_indices = @transform_2, window_bounds = array<i64: 1, 128>}, {pipeline_mode = #tpu.pipeline_mode<synchronous>, transform_indices = @transform_3, window_bounds = array<i64: 128, 64>}, {pipeline_mode = #tpu.pipeline_mode<synchronous>, transform_indices = @transform_4, window_bounds = array<i64: 1, 64>}, {pipeline_mode = #tpu.pipeline_mode<synchronous>, transform_indices = @transform_5, window_bounds = array<i64: 64, 128>}, {pipeline_mode = #tpu.pipeline_mode<synchronous>, transform_indices = @transform_6, window_bounds = array<i64: 1, 128>}, {transform_indices = @transform_7, window_bounds = array<i64: 8, 128>}]} {
    %c0 = arith.constant 0 : index
    %c0_0 = arith.constant 0 : index
    %0 = vector.load %arg1[%c0, %c0_0] : memref<8x256xf32, #tpu.memory_space<vmem>>, vector<8x256xf32>
    %1 = arith.truncf %0 : vector<8x256xf32> to vector<8x256xbf16>
    %c0_1 = arith.constant 0 : index
    %c0_2 = arith.constant 0 : index
    %2 = vector.load %arg2[%c0_1, %c0_2] : memref<256x128xbf16, #tpu.memory_space<vmem>>, vector<256x128xbf16>
    %cst = arith.constant dense<0.000000e+00> : vector<8x128xf32>
    %3 = tpu.matmul %1, %2, %cst {dimension_numbers = #tpu.dot_dimension_numbers<[1], [0], [0], [1], [0, 0, 1, 1], [], []>} : vector<8x256xbf16>, vector<256x128xbf16>, vector<8x128xf32> -> vector<8x128xf32>
    %c0_3 = arith.constant 0 : index
    %c0_4 = arith.constant 0 : index
    %4 = vector.load %arg3[%c0_3, %c0_4] : memref<1x128xf32, #tpu.memory_space<vmem>>, vector<1x128xf32>
    %5 = vector.broadcast %4 : vector<1x128xf32> to vector<8x128xf32>
    %6 = arith.addf %3, %5 : vector<8x128xf32>
    %cst_5 = arith.constant 0.000000e+00 : f32
    %7 = vector.broadcast %cst_5 : f32 to vector<8x128xf32>
    %8 = arith.maximumf %6, %7 : vector<8x128xf32>
    %9 = arith.truncf %8 : vector<8x128xf32> to vector<8x128xbf16>
    %c0_6 = arith.constant 0 : index
    %c0_7 = arith.constant 0 : index
    %10 = vector.load %arg4[%c0_6, %c0_7] : memref<128x64xbf16, #tpu.memory_space<vmem>>, vector<128x64xbf16>
    %cst_8 = arith.constant dense<0.000000e+00> : vector<8x64xf32>
    %11 = tpu.matmul %9, %10, %cst_8 {dimension_numbers = #tpu.dot_dimension_numbers<[1], [0], [0], [1], [0, 0, 1, 1], [], []>} : vector<8x128xbf16>, vector<128x64xbf16>, vector<8x64xf32> -> vector<8x64xf32>
    %c0_9 = arith.constant 0 : index
    %c0_10 = arith.constant 0 : index
    %12 = vector.load %arg5[%c0_9, %c0_10] : memref<1x64xf32, #tpu.memory_space<vmem>>, vector<1x64xf32>
    %13 = vector.broadcast %12 : vector<1x64xf32> to vector<8x64xf32>
    %14 = arith.addf %11, %13 : vector<8x64xf32>
    %cst_11 = arith.constant 0.000000e+00 : f32
    %15 = vector.broadcast %cst_11 : f32 to vector<8x64xf32>
    %16 = arith.maximumf %14, %15 : vector<8x64xf32>
    %17 = arith.truncf %16 : vector<8x64xf32> to vector<8x64xbf16>
    %c0_12 = arith.constant 0 : index
    %c0_13 = arith.constant 0 : index
    %18 = vector.load %arg6[%c0_12, %c0_13] : memref<64x128xbf16, #tpu.memory_space<vmem>>, vector<64x128xbf16>
    %cst_14 = arith.constant dense<0.000000e+00> : vector<8x128xf32>
    %19 = tpu.matmul %17, %18, %cst_14 {dimension_numbers = #tpu.dot_dimension_numbers<[1], [0], [0], [1], [0, 0, 1, 1], [], []>} : vector<8x64xbf16>, vector<64x128xbf16>, vector<8x128xf32> -> vector<8x128xf32>
    %c0_15 = arith.constant 0 : index
    %c0_16 = arith.constant 0 : index
    %20 = vector.load %arg7[%c0_15, %c0_16] : memref<1x128xf32, #tpu.memory_space<vmem>>, vector<1x128xf32>
    %21 = vector.broadcast %20 : vector<1x128xf32> to vector<8x128xf32>
    %22 = arith.addf %19, %21 : vector<8x128xf32>
    %cst_17 = arith.constant dense<0xFF800000> : vector<8xf32>
    %23 = vector.multi_reduction <maximumf>, %22, %cst_17 [1] : vector<8x128xf32> to vector<8xf32>
    %24 = vector.shape_cast %23 : vector<8xf32> to vector<8x1xf32>
    %25 = vector.broadcast %24 : vector<8x1xf32> to vector<8x128xf32>
    %26 = arith.subf %22, %25 : vector<8x128xf32>
    %27 = math.exp %26 : vector<8x128xf32>
    %cst_18 = arith.constant dense<0.000000e+00> : vector<8xf32>
    %28 = vector.multi_reduction <add>, %27, %cst_18 [1] : vector<8x128xf32> to vector<8xf32>
    %29 = vector.shape_cast %28 : vector<8xf32> to vector<8x1xf32>
    %30 = math.log %29 : vector<8x1xf32>
    %31 = vector.broadcast %30 : vector<8x1xf32> to vector<8x128xf32>
    %32 = arith.subf %26, %31 : vector<8x128xf32>
    %33 = arith.truncf %32 : vector<8x128xf32> to vector<8x128xbf16>
    %c0_19 = arith.constant 0 : index
    %c0_20 = arith.constant 0 : index
    %34 = vector.load %arg8[%c0_19, %c0_20] : memref<8x128xbf16, #tpu.memory_space<vmem>>, vector<8x128xbf16>
    tpu.vector_store %arg8[%c0_19, %c0_20], %33 {strides = array<i32>} : memref<8x128xbf16, #tpu.memory_space<vmem>>, vector<8x128xbf16>,
    return
  }
  func.func @transform_0(%arg0: i32) -> (i32, i32) {
    %c0_i32 = arith.constant 0 : i32
    %c0_i32_0 = arith.constant 0 : i32
    return %arg0, %c0_i32 : i32, i32
  }
  func.func @transform_1(%arg0: i32) -> (i32, i32) {
    %c0_i32 = arith.constant 0 : i32
    %c0_i32_0 = arith.constant 0 : i32
    %c0_i32_1 = arith.constant 0 : i32
    return %c0_i32, %c0_i32_0 : i32, i32
  }
  func.func @transform_2(%arg0: i32) -> (i32, i32) {
    %c0_i32 = arith.constant 0 : i32
    %c0_i32_0 = arith.constant 0 : i32
    %c0_i32_1 = arith.constant 0 : i32
    return %c0_i32, %c0_i32_0 : i32, i32
  }
  func.func @transform_3(%arg0: i32) -> (i32, i32) {
    %c0_i32 = arith.constant 0 : i32
    %c0_i32_0 = arith.constant 0 : i32
    %c0_i32_1 = arith.constant 0 : i32
    return %c0_i32, %c0_i32_0 : i32, i32
  }
  func.func @transform_4(%arg0: i32) -> (i32, i32) {
    %c0_i32 = arith.constant 0 : i32
    %c0_i32_0 = arith.constant 0 : i32
    %c0_i32_1 = arith.constant 0 : i32
    return %c0_i32, %c0_i32_0 : i32, i32
  }
  func.func @transform_5(%arg0: i32) -> (i32, i32) {
    %c0_i32 = arith.constant 0 : i32
    %c0_i32_0 = arith.constant 0 : i32
    %c0_i32_1 = arith.constant 0 : i32
    return %c0_i32, %c0_i32_0 : i32, i32
  }
  func.func @transform_6(%arg0: i32) -> (i32, i32) {
    %c0_i32 = arith.constant 0 : i32
    %c0_i32_0 = arith.constant 0 : i32
    %c0_i32_1 = arith.constant 0 : i32
    return %c0_i32, %c0_i32_0 : i32, i32
  }
  func.func @transform_7(%arg0: i32) -> (i32, i32) {
    %c0_i32 = arith.constant 0 : i32
    %c0_i32_0 = arith.constant 0 : i32
    return %arg0, %c0_i32 : i32, i32
  }
}

</mosaic_0001>

<bundles_post_ra>
// kernel: tpu_custom_call.1
= control target key start
LH: loop header
LB: loop body
LE: loop exit
PB: predicated region body
PF: predicated region fallthrough
CT: control target
= control target key end

     0   :  { %12 = vsyncpa [#allocation3], 0  ;;  %s767_s0 = inlined_call_operand.vmem [shape: f32[8,256], index: 0, kind: input, shape index: {}]   ;;  %s768_s1 = inlined_call_operand.hbm [shape: bf16[256,128], index: 1, kind: input, shape index: {}]   ;;  %s769_s2 = inlined_call_operand.vmem [shape: f32[1,128], index: 2, kind: input, shape index: {}]   ;;  %s770_s3 = inlined_call_operand.vmem [shape: bf16[128,64], index: 3, kind: input, shape index: {}]   ;;  %s771_s4 = inlined_call_operand.vmem [shape: f32[1,64], index: 4, kind: input, shape index: {}]   ;;  %s772_s5 = inlined_call_operand.vmem [shape: bf16[64,128], index: 5, kind: input, shape index: {}]   ;;  %s773_s6 = inlined_call_operand.vmem [shape: f32[1,128], index: 6, kind: input, shape index: {}]   ;;  %s774_s7 = inlined_call_operand.hbm [shape: bf16[8,128], index: 7, kind: output, shape index: {}]  }
   0x1   :  { %13 = vsyncpa [#allocation4], 0  ;;  %s632_s24 = smov [#allocation2]   ;;  %s584_s28 = scalar_lea.hbm %s768_s1, 2048 }
   0x2   :  { %s21_s25 = sshll.u32 %s632_s24, 4  ;;  %p585_p0 = scmp.ne.s32.totalorder %s768_s1, %s584_s28  ;;  %s22_s25 = int_to_ptr.vmem [resolvable:$true] %s21_s25 }
   0x3   :  { %p588_p1 = scmp.lt.u32.totalorder %s584_s28, %s768_s1 }
   0x5   :  { %p590_p2 = pnand %p588_p1, %p585_p0 }
   0x7   :  { %593 = shalt.err (!%p590_p2)
}
   0x8   :  { %s594_s10 = scalar_lea.vmem %s22_s25, 2048  ;;  %p599_p4 = scmp.lt.s32.totalorder %s22_s25, %s22_s25 }
   0x9   :  { %p595_p3 = scmp.ne.s32.totalorder %s22_s25, %s594_s10  ;;  %p600_p5 = scmp.lt.s32.totalorder %s594_s10, %s594_s10 }
   0xb   :  { %p601_p6 = por %p600_p5, %p599_p4 }
   0xd   :  { %p602_p7 = pnand %p601_p6, %p595_p3 }
   0xf   :  { %605 = shalt.err (!%p602_p7)
}
  0x10   :  { %s633_s11 = smov 64   ;;  %s634_s12 = smov 4  }
  0x11   :  { %27 = dma.hbm_to_vmem [thread:$0]  %s768_s1, 2048, %s22_s25, [#allocation3], %s633_s11, %s633_s11, %s634_s12  }
  0x12   :  { %628 = dma.done.wait [#allocation3], 2048  }
  0x13   :  { %629 = vsyncadd [#allocation3], 4294965248  ;;  %v635_v0 = vmov 0.0   ;;  %v552_v1 = vld [vmem:[#allocation2 + $0x40] sm:$0xff]   ;;  %v554_v3 = vld [vmem:[#allocation2 + $0x48] sm:$0xff]   ;;  %vm636_vm0 = vmmov 0  }
  0x14   :  { %514 = vmatprep.subr.bf16.mxu1 %v635_v0  ;;  %v553_v2 = vld [vmem:[#allocation2] sm:$0xff]   ;;  %478 = vmatprep.subr.bf16.mxu0 %v552_v1  ;;  %v555_v4 = vld [vmem:[#allocation2 + $0x8] sm:$0xff]   ;;  %v556_v5 = vld [vmem:[#allocation2 + $0x50] sm:$0xff]   ;;  %vm375_vm1 = vcmask 523264  }
  0x15   :  { %479 = vmatpush3.bf16.msra.mxu0 %v553_v2  ;;  %v557_v6 = vld [vmem:[#allocation2 + $0x10] sm:$0xff]   ;;  %v558_v7 = vld [vmem:[#allocation2 + $0x58] sm:$0xff]   ;;  %v560_v9 = vld [vmem:[#allocation2 + $0x60] sm:$0xff]   ;;  %530 = vmatprep.mubr.msk.bf16.mxu1 %vm636_vm0, %v635_v0 }
  0x16   :  { %480 = vmatprep.subr.bf16.mxu0 %v554_v3  ;;  %v559_v8 = vld [vmem:[#allocation2 + $0x18] sm:$0xff]   ;;  %v561_v10 = vld [vmem:[#allocation2 + $0x20] sm:$0xff]   ;;  %v562_v11 = vld [vmem:[#allocation2 + $0x68] sm:$0xff]  }
  0x17   :  { %v43_v12 = vld [vmem:[%s767_s0 + $0x8] sm:$0xff]  ;;  %v568_v14 = vld [vmem:[%s770_s3] sm:$0xff]   ;;  %v564_v16 = vld [vmem:[#allocation2 + $0x70] sm:$0xff]  }
  0x18   :  { %v45_v13 = vpack.c.bf16 %v43_v12, %v43_v12  ;;  %v563_v15 = vld [vmem:[#allocation2 + $0x28] sm:$0xff]   ;;  %515 = vmatpush3.bf16.msra.mxu1 %v568_v14  ;;  %v565_v18 = vld [vmem:[#allocation2 + $0x30] sm:$0xff]   ;;  %v566_v19 = vld [vmem:[#allocation2 + $0x78] sm:$0xff]  }
  0x19   :  { %481 = vmatpush3.bf16.msra.mxu0 %v555_v4  ;;  %v569_v17 = vld [vmem:[%s770_s3 + $0x8] sm:$0xff]   ;;  %516 = vmatprep.subr.bf16.mxu1 %v635_v0  ;;  %v570_v20 = vld [vmem:[%s770_s3 + $0x10] sm:$0xff]   ;;  %v567_v21 = vld [vmem:[#allocation2 + $0x38] sm:$0xff]  }
  0x1a   :  { %482 = vmatprep.subr.bf16.mxu0 %v556_v5  ;;  %213 = vmatprep.mubr.bf16.mxu0 %v45_v13  ;;  %v42_v22 = vld [vmem:[%s767_s0] sm:$0xff]  ;;  %v571_v23 = vld [vmem:[%s770_s3 + $0x18] sm:$0xff]   ;;  %v573_v26 = vld [vmem:[%s770_s3 + $0x28] sm:$0xff]  }
  0x1b   :  { %v44_v24 = vpack.c.bf16 %v42_v22, %v42_v22  ;;  %v572_v25 = vld [vmem:[%s770_s3 + $0x20] sm:$0xff]   ;;  %v574_v27 = vld [vmem:[%s770_s3 + $0x30] sm:$0xff]   ;;  %v575_v28 = vld [vmem:[%s770_s3 + $0x38] sm:$0xff]  }
  0x1c   :  { %517 = vmatpush3.bf16.msra.mxu1 %v569_v17  ;;  %v576_v29 = vld [vmem:[%s772_s5] sm:$0xff]   ;;  %v577_v30 = vld [vmem:[%s772_s5 + $0x8] sm:$0xff]   ;;  %v578_v40 = vld [vmem:[%s772_s5 + $0x10] sm:$0xff]  }
  0x1d   :  { %483 = vmatpush3.bf16.msra.mxu0 %v557_v6  ;;  %518 = vmatprep.subr.bf16.mxu1 %v635_v0  ;;  %v446_v32 = vld [vmem:[%s769_s2] ss:$0 sm:$0xff]  ;;  %v579_v41 = vld [vmem:[%s772_s5 + $0x18] sm:$0xff]  }
  0x1e   :  { %484 = vmatprep.subr.bf16.mxu0 %v558_v7  ;;  %v463_v42 = vld [vmem:[%s771_s4] ss:$0 sm:$0xff]  ;;  %s637_s4 = smov [#allocation5]  }
  0x1f   :  { %v472_v50 = vld [vmem:[%s773_s6] ss:$0 sm:$0xff]  ;;  %s437_s5 = sshll.u32 %s637_s4, 4  ;;  %s438_s5 = int_to_ptr.vmem [resolvable:$true] %s437_s5 }
  0x20   :  { %519 = vmatpush3.bf16.msra.mxu1 %v570_v20  ;;  %s606_s6 = scalar_lea.vmem %s438_s5, 64  ;;  %p611_p9 = scmp.lt.s32.totalorder %s438_s5, %s438_s5 }
  0x21   :  { %485 = vmatpush3.bf16.msra.mxu0 %v559_v8  ;;  %520 = vmatprep.subr.bf16.mxu1 %v635_v0  ;;  %p607_p8 = scmp.ne.s32.totalorder %s438_s5, %s606_s6  ;;  %p612_p10 = scmp.lt.s32.totalorder %s606_s6, %s606_s6 }
  0x22   :  { %486 = vmatprep.subr.bf16.mxu0 %v560_v9 }
  0x23   :  { %p613_p11 = por %p612_p10, %p611_p9 }
  0x24   :  { %521 = vmatpush3.bf16.msra.mxu1 %v571_v23 }
  0x25   :  { %487 = vmatpush3.bf16.msra.mxu0 %v561_v10  ;;  %522 = vmatprep.subr.bf16.mxu1 %v635_v0  ;;  %p614_p12 = pnand %p613_p11, %p607_p8 }
  0x26   :  { %488 = vmatprep.subr.bf16.mxu0 %v562_v11 }
  0x28   :  { %523 = vmatpush3.bf16.msra.mxu1 %v572_v25 }
  0x29   :  { %489 = vmatpush3.bf16.msra.mxu0 %v563_v15  ;;  %524 = vmatprep.subr.bf16.mxu1 %v635_v0 }
  0x2a   :  { %490 = vmatprep.subr.bf16.mxu0 %v564_v16 }
  0x2c   :  { %525 = vmatpush3.bf16.msra.mxu1 %v573_v26 }
  0x2d   :  { %491 = vmatpush3.bf16.msra.mxu0 %v565_v18  ;;  %526 = vmatprep.subr.bf16.mxu1 %v635_v0 }
  0x2e   :  { %492 = vmatprep.subr.bf16.mxu0 %v566_v19 }
  0x30   :  { %527 = vmatpush3.bf16.msra.mxu1 %v574_v27 }
  0x31   :  { %493 = vmatpush3.bf16.msra.mxu0 %v567_v21  ;;  %528 = vmatprep.subr.bf16.mxu1 %v635_v0 }
  0x32   :  { %534 = vmatprep.subr.bf16.mxu0 %v635_v0 }
  0x34   :  { %214 = vmatmul.mubr.bf16.vlgmr.msra.gmra.mrb[0].mxu0 %v44_v24  ;;  %529 = vmatpush3.bf16.msra.mxu1 %v575_v28 }
  0x35   :  { %542 = vmatprep.mubr.msk.bf16.mxu0 %vm636_vm0, %v635_v0  ;;  %535 = vmatpush3.bf16.msra.mxu0 %v576_v29 }
  0x36   :  { %536 = vmatprep.subr.bf16.mxu0 %v635_v0 }
  0x39   :  { %537 = vmatpush3.bf16.msra.mxu0 %v577_v30 }
  0x3a   :  { %538 = vmatprep.subr.bf16.mxu0 %v635_v0 }
  0x3d   :  { %539 = vmatpush3.bf16.msra.mxu0 %v578_v40 }
  0x3e   :  { %540 = vmatprep.subr.bf16.mxu0 %v635_v0 }
  0x41   :  { %541 = vmatpush3.bf16.msra.mxu0 %v579_v41 }
 0x107   :  { %v494_v31 = vpop.f32.mrb[0].mxu0 }
 0x108   :  { %v495_v33 = vpop.f32.mrb[1].mxu0 }
 0x109   :  { %v496_v34 = vadd.f32 %v495_v33, %v494_v31  ;;  %v497_v35 = vpop.f32.mrb[2].mxu0 }
 0x10a   :  { %v498_v36 = vpop.f32.mrb[3].mxu0 }
 0x10b   :  { %v216_v37 = vadd.f32 %v496_v34, %v446_v32 }
 0x10d   :  { %v221_v38 = vmax.f32 %v216_v37, 0.0 }
 0x10f   :  { %v222_v39 = vpack.c.bf16 %v221_v38, %v221_v38 }
 0x111   :  { %531 = vmatmul.mubr.bf16.vlgmr.msra.gmra.mrb[0].mxu1 %v222_v39 }
 0x1e4   :  { %v328_v43 = vpop.f32.mrb[0].mxu1 }
 0x1e5   :  { %v329_v44 = vadd.f32 %v463_v42, %v328_v43  ;;  %v532_v45 = vpop.f32.mrb[1].mxu1 }
 0x1e6   :  { %v331_v46 = vpop.f32.mrb[2].mxu1 }
 0x1e7   :  { %v334_v47 = vmax.f32 %v329_v44, 0.0  ;;  %v533_v48 = vpop.f32.mrb[3].mxu1 }
 0x1e9   :  { %v335_v49 = vpack.c.bf16 %v334_v47, %v334_v47 }
 0x1eb   :  { %543 = vmatmul.mubr.msk.bf16.vlgmr.msra.gmra.mrb[4].mxu0 %vm375_vm1, %v335_v49 }
 0x2be   :  { %v413_v51 = vpop.f32.mrb[4].mxu0 }
 0x2bf   :  { %v414_v52 = vadd.f32 %v472_v50, %v413_v51  ;;  %v544_v53 = vpop.f32.mrb[5].mxu0 }
 0x2c0   :  { %v416_v54 = vpop.f32.mrb[6].mxu0 }
 0x2c1   :  { %419 = vmax.xlane.f32.xlu0 %v414_v52  ;;  %v545_v55 = vpop.f32.mrb[7].mxu0 }
 0x34e   :  { %v420_v56 = vpop.xlane.xlu0 %419 }
 0x34f   :  { %v421_v57 = vsub.f32 %v414_v52, %v420_v56 }
 0x351   :  { %v422_v58 = vmul.f32 1.442695, %v421_v57 }
 0x353   :  { %580 = vpow2.f32 %v422_v58 }
 0x35d   :  { %v581_v59 = vpop.eup %580 }
 0x35e   :  { %424 = vadd.xlane.f32.xlu0 %v581_v59 }
 0x3eb   :  { %v425_v60 = vpop.xlane.xlu0 %424 }
 0x3ec   :  { %582 = vlog2.f32 %v425_v60 }
 0x3f6   :  { %v583_v61 = vpop.eup %582 }
 0x3f7   :  { %v427_v62 = vmul.f32 0.6931472, %v583_v61 }
 0x3f9   :  { %v428_v63 = vsub.f32 %v421_v57, %v427_v62 }
 0x3fb   :  { %v429_v0 = vpack.c.bf16 %v428_v63, %v428_v63 }
 0x3fd   :  { %430 = vst [vmem:[#allocation5] sm:$0xf] %v429_v0 }
 0x3fe   :  { %617 = shalt.err (!%p614_p12)
}
 0x3ff   :  { %s618_s23 = scalar_lea.hbm %s774_s7, 64 }
 0x400   :  { %p619_p13 = scmp.ne.s32.totalorder %s774_s7, %s618_s23  ;;  %p622_p0 = scmp.lt.u32.totalorder %s618_s23, %s774_s7 }
 0x402   :  { %p624_p1 = pnand %p622_p0, %p619_p13 }
 0x404   :  { %627 = shalt.err (!%p624_p1)
}
 0x405   :  { %440 = dma.vmem_to_hbm [thread:$0]  %s438_s5, 64, %s774_s7, [#allocation4]  }
 0x406   :  { %630 = dma.done.wait [#allocation4], 64  }
 0x407   :  { %631 = vsyncadd [#allocation4], 4294967232 }
 0x408   :  { %444 = vsyncpa [#allocation3], 1 }
 0x409   :  { %445 = vsyncpa [#allocation4], 1 }

</bundles_post_ra>
